<compile_context>
chip_gen: v7x
topology: tpu7x:2x2x1
jax: 0.10.0
libtpu: 0.0.40
codegen_flags: <defaults>
</compile_context>

<pallas_src>
import functools

import jax
import jax.numpy as jnp
from jax.experimental import pallas as pl
from jax.experimental.pallas import tpu as pltpu

HIDDEN = 256  # fixed by the module definition (fc1/fc2 -> 256)


def _round_up(v: int, m: int) -> int:
    return (v + m - 1) // m * m


def _mlp_kernel(x_ref, w1_ref, b1_ref, w2_ref, b2_ref, w3_ref, b3_ref, o_ref):
    # All three matmuls + bias + ReLU fused in one kernel invocation.
    # x / weights are bf16 (MXU-native); accumulation, bias add and ReLU in f32.
    x = x_ref[...]                                           # bf16 [tile, Dp]

    h1 = jnp.dot(x, w1_ref[...], preferred_element_type=jnp.float32) + b1_ref[...]
    h1 = jnp.maximum(h1, 0.0).astype(jnp.bfloat16)           # ReLU (dropout = identity)

    h2 = jnp.dot(h1, w2_ref[...], preferred_element_type=jnp.float32) + b2_ref[...]
    h2 = jnp.maximum(h2, 0.0).astype(jnp.bfloat16)           # ReLU (dropout = identity)

    y = jnp.dot(h2, w3_ref[...], preferred_element_type=jnp.float32) + b3_ref[...]
    o_ref[...] = y.astype(o_ref.dtype)


@functools.partial(jax.jit, static_argnames=("tile_n",))
def mlp_encoder_pallas(x, w1, b1, w2, b2, w3, b3, *, tile_n=512):
    """x: [N, D] float32. Weights: [in, out] float32; biases [out]."""
    n, d = x.shape

    # Lane-dense feature dim (multiple of 128) -> unmasked vector stores.
    dp = _round_up(max(d, 128), 128)
    # Row tile: large (default 512) but never larger than the (8-aligned) row
    # count; pad N up to a multiple of the tile so any N is supported.
    n8 = _round_up(n, 8)
    tile = min(tile_n, n8)
    n_pad = _round_up(n8, tile)
    grid = (n_pad // tile,)

    # Zero-pad + cast operands.  Zero rows of W1 / zero cols of W3+b3 keep the
    # math exact on the un-padded region; padded rows of x are sliced off.
    xp = jnp.pad(x.astype(jnp.bfloat16), ((0, n_pad - n), (0, dp - d)))
    w1p = jnp.pad(w1.astype(jnp.bfloat16), ((0, dp - d), (0, 0)))      # [Dp, 256]
    w2b = w2.astype(jnp.bfloat16)                                      # [256, 256]
    w3p = jnp.pad(w3.astype(jnp.bfloat16), ((0, 0), (0, dp - d)))      # [256, Dp]
    b1_2d = b1.reshape(1, HIDDEN).astype(jnp.float32)
    b2_2d = b2.reshape(1, HIDDEN).astype(jnp.float32)
    b3_2d = jnp.pad(b3.reshape(1, d).astype(jnp.float32), ((0, 0), (0, dp - d)))

    flops = 2 * n * (d * HIDDEN + HIDDEN * HIDDEN + HIDDEN * d)
    bytes_accessed = (
        n * d * 4                                             # x (caller f32)
        + (d * HIDDEN + HIDDEN * HIDDEN + HIDDEN * d) * 2     # bf16 weights
        + (HIDDEN + HIDDEN + d) * 4                           # biases
        + n * d * 4                                           # output
    )

    out = pl.pallas_call(
        _mlp_kernel,
        out_shape=jax.ShapeDtypeStruct((n_pad, dp), jnp.float32),
        grid_spec=pltpu.PrefetchScalarGridSpec(
            num_scalar_prefetch=0,
            grid=grid,
            in_specs=[
                pl.BlockSpec((tile, dp), lambda i: (i, 0)),       # x tile (bf16)
                pl.BlockSpec((dp, HIDDEN), lambda i: (0, 0)),     # W1 (resident)
                pl.BlockSpec((1, HIDDEN), lambda i: (0, 0)),      # b1
                pl.BlockSpec((HIDDEN, HIDDEN), lambda i: (0, 0)), # W2 (resident)
                pl.BlockSpec((1, HIDDEN), lambda i: (0, 0)),      # b2
                pl.BlockSpec((HIDDEN, dp), lambda i: (0, 0)),     # W3 (resident)
                pl.BlockSpec((1, dp), lambda i: (0, 0)),          # b3
            ],
            out_specs=pl.BlockSpec((tile, dp), lambda i: (i, 0)), # lane-dense out
        ),
        compiler_params=pltpu.CompilerParams(
            dimension_semantics=("parallel",),      # shards grid over v7x's 2 TCs
            # Budget: double-buffered bf16 x tiles + f32 out tiles at tile=512,
            # Dp>=128 plus resident bf16 weights and f32 temporaries stay well
            # under a few MiB; 32 MiB is safe on v5e/v6e (128 MiB) and v7x (64 MiB).
            vmem_limit_bytes=32 * 1024 * 1024,
        ),
        cost_estimate=pl.CostEstimate(
            flops=flops, transcendentals=0, bytes_accessed=bytes_accessed),
    )(xp, w1p, b1_2d, w2b, b2_2d, w3p, b3_2d)

    return out[:n, :d]


def init_params(key, input_dim):
    """Deterministic init mimicking nn.Linear default (uniform +/- 1/sqrt(fan_in)).
    Weights stored as [in, out] (i.e. PyTorch W transposed)."""
    ks = jax.random.split(key, 6)

    def lin(kw, kb, fan_in, fan_out):
        bound = 1.0 / jnp.sqrt(fan_in)
        w = jax.random.uniform(kw, (fan_in, fan_out), jnp.float32, -bound, bound)
        b = jax.random.uniform(kb, (fan_out,), jnp.float32, -bound, bound)
        return w, b

    w1, b1 = lin(ks[0], ks[1], input_dim, HIDDEN)
    w2, b2 = lin(ks[2], ks[3], HIDDEN, HIDDEN)
    w3, b3 = lin(ks[4], ks[5], HIDDEN, input_dim)
    return w1, b1, w2, b2, w3, b3


def mlp_encoder_ref(x, w1, b1, w2, b2, w3, b3):
    h1 = jnp.maximum(x @ w1 + b1, 0.0)
    h2 = jnp.maximum(h1 @ w2 + b2, 0.0)
    return h2 @ w3 + b3


if __name__ == "__main__":
    key = jax.random.PRNGKey(0)
    k_x, k_p = jax.random.split(key)

    batch, seq, input_dim = 2, 8, 32
    x = jax.random.normal(k_x, (batch, seq, input_dim), jnp.float32)
    x2d = x.reshape(batch * seq, input_dim)  # layout: [N, input_dim]

    params = init_params(k_p, input_dim)

    out = mlp_encoder_pallas(x2d, *params)
    out = jax.block_until_ready(out)

    ref = mlp_encoder_ref(x2d, *params)
    assert out.shape == (batch * seq, input_dim)
    # bf16 matmuls with f32 accumulation: relaxed tolerance vs f32 reference.
    assert jnp.allclose(out, ref, atol=5e-2, rtol=5e-2), "mismatch vs reference"

    print("KERNEL_OK")
</pallas_src>

<mosaic_0001>
module attributes {stable_mosaic.version = 11 : i64} {
  func.func @_mlp_kernel(%arg0: i32, %arg1: memref<16x128xbf16, #tpu.memory_space<vmem>>, %arg2: memref<128x256xbf16, #tpu.memory_space<vmem>>, %arg3: memref<1x256xf32, #tpu.memory_space<vmem>>, %arg4: memref<256x256xbf16, #tpu.memory_space<vmem>>, %arg5: memref<1x256xf32, #tpu.memory_space<vmem>>, %arg6: memref<256x128xbf16, #tpu.memory_space<vmem>>, %arg7: memref<1x128xf32, #tpu.memory_space<vmem>>, %arg8: memref<16x128xf32, #tpu.memory_space<vmem>>) attributes {dimension_semantics = [#tpu.dimension_semantics<parallel>], iteration_bounds = array<i64: 1>, scalar_prefetch = 0 : i64, scratch_operands = 0 : i64, tpu.core_type = #tpu.core_type<tc>, window_params = [{transform_indices = @transform_0, window_bounds = array<i64: 16, 128>}, {pipeline_mode = #tpu.pipeline_mode<synchronous>, transform_indices = @transform_1, window_bounds = array<i64: 128, 256>}, {pipeline_mode = #tpu.pipeline_mode<synchronous>, transform_indices = @transform_2, window_bounds = array<i64: 1, 256>}, {pipeline_mode = #tpu.pipeline_mode<synchronous>, transform_indices = @transform_3, window_bounds = array<i64: 256, 256>}, {pipeline_mode = #tpu.pipeline_mode<synchronous>, transform_indices = @transform_4, window_bounds = array<i64: 1, 256>}, {pipeline_mode = #tpu.pipeline_mode<synchronous>, transform_indices = @transform_5, window_bounds = array<i64: 256, 128>}, {pipeline_mode = #tpu.pipeline_mode<synchronous>, transform_indices = @transform_6, window_bounds = array<i64: 1, 128>}, {transform_indices = @transform_7, window_bounds = array<i64: 16, 128>}]} {
    %c0 = arith.constant 0 : index
    %c0_0 = arith.constant 0 : index
    %0 = vector.load %arg1[%c0, %c0_0] : memref<16x128xbf16, #tpu.memory_space<vmem>>, vector<16x128xbf16>
    %c0_1 = arith.constant 0 : index
    %c0_2 = arith.constant 0 : index
    %1 = vector.load %arg2[%c0_1, %c0_2] : memref<128x256xbf16, #tpu.memory_space<vmem>>, vector<128x256xbf16>
    %cst = arith.constant dense<0.000000e+00> : vector<16x256xf32>
    %2 = tpu.matmul %0, %1, %cst {dimension_numbers = #tpu.dot_dimension_numbers<[1], [0], [0], [1], [0, 0, 1, 1], [], []>} : vector<16x128xbf16>, vector<128x256xbf16>, vector<16x256xf32> -> vector<16x256xf32>
    %c0_3 = arith.constant 0 : index
    %c0_4 = arith.constant 0 : index
    %3 = vector.load %arg3[%c0_3, %c0_4] : memref<1x256xf32, #tpu.memory_space<vmem>>, vector<1x256xf32>
    %4 = vector.broadcast %3 : vector<1x256xf32> to vector<16x256xf32>
    %5 = arith.addf %2, %4 : vector<16x256xf32>
    %cst_5 = arith.constant 0.000000e+00 : f32
    %6 = vector.broadcast %cst_5 : f32 to vector<16x256xf32>
    %7 = arith.maximumf %5, %6 : vector<16x256xf32>
    %8 = arith.truncf %7 : vector<16x256xf32> to vector<16x256xbf16>
    %c0_6 = arith.constant 0 : index
    %c0_7 = arith.constant 0 : index
    %9 = vector.load %arg4[%c0_6, %c0_7] : memref<256x256xbf16, #tpu.memory_space<vmem>>, vector<256x256xbf16>
    %cst_8 = arith.constant dense<0.000000e+00> : vector<16x256xf32>
    %10 = tpu.matmul %8, %9, %cst_8 {dimension_numbers = #tpu.dot_dimension_numbers<[1], [0], [0], [1], [0, 0, 1, 1], [], []>} : vector<16x256xbf16>, vector<256x256xbf16>, vector<16x256xf32> -> vector<16x256xf32>
    %c0_9 = arith.constant 0 : index
    %c0_10 = arith.constant 0 : index
    %11 = vector.load %arg5[%c0_9, %c0_10] : memref<1x256xf32, #tpu.memory_space<vmem>>, vector<1x256xf32>
    %12 = vector.broadcast %11 : vector<1x256xf32> to vector<16x256xf32>
    %13 = arith.addf %10, %12 : vector<16x256xf32>
    %cst_11 = arith.constant 0.000000e+00 : f32
    %14 = vector.broadcast %cst_11 : f32 to vector<16x256xf32>
    %15 = arith.maximumf %13, %14 : vector<16x256xf32>
    %16 = arith.truncf %15 : vector<16x256xf32> to vector<16x256xbf16>
    %c0_12 = arith.constant 0 : index
    %c0_13 = arith.constant 0 : index
    %17 = vector.load %arg6[%c0_12, %c0_13] : memref<256x128xbf16, #tpu.memory_space<vmem>>, vector<256x128xbf16>
    %cst_14 = arith.constant dense<0.000000e+00> : vector<16x128xf32>
    %18 = tpu.matmul %16, %17, %cst_14 {dimension_numbers = #tpu.dot_dimension_numbers<[1], [0], [0], [1], [0, 0, 1, 1], [], []>} : vector<16x256xbf16>, vector<256x128xbf16>, vector<16x128xf32> -> vector<16x128xf32>
    %c0_15 = arith.constant 0 : index
    %c0_16 = arith.constant 0 : index
    %19 = vector.load %arg7[%c0_15, %c0_16] : memref<1x128xf32, #tpu.memory_space<vmem>>, vector<1x128xf32>
    %20 = vector.broadcast %19 : vector<1x128xf32> to vector<16x128xf32>
    %21 = arith.addf %18, %20 : vector<16x128xf32>
    %c0_17 = arith.constant 0 : index
    %c0_18 = arith.constant 0 : index
    %22 = vector.load %arg8[%c0_17, %c0_18] : memref<16x128xf32, #tpu.memory_space<vmem>>, vector<16x128xf32>
    tpu.vector_store %arg8[%c0_17, %c0_18], %21 {strides = array<i32>} : memref<16x128xf32, #tpu.memory_space<vmem>>, vector<16x128xf32>,
    return
  }
  func.func @transform_0(%arg0: i32) -> (i32, i32) {
    %c0_i32 = arith.constant 0 : i32
    %c0_i32_0 = arith.constant 0 : i32
    return %arg0, %c0_i32 : i32, i32
  }
  func.func @transform_1(%arg0: i32) -> (i32, i32) {
    %c0_i32 = arith.constant 0 : i32
    %c0_i32_0 = arith.constant 0 : i32
    %c0_i32_1 = arith.constant 0 : i32
    return %c0_i32, %c0_i32_0 : i32, i32
  }
  func.func @transform_2(%arg0: i32) -> (i32, i32) {
    %c0_i32 = arith.constant 0 : i32
    %c0_i32_0 = arith.constant 0 : i32
    %c0_i32_1 = arith.constant 0 : i32
    return %c0_i32, %c0_i32_0 : i32, i32
  }
  func.func @transform_3(%arg0: i32) -> (i32, i32) {
    %c0_i32 = arith.constant 0 : i32
    %c0_i32_0 = arith.constant 0 : i32
    %c0_i32_1 = arith.constant 0 : i32
    return %c0_i32, %c0_i32_0 : i32, i32
  }
  func.func @transform_4(%arg0: i32) -> (i32, i32) {
    %c0_i32 = arith.constant 0 : i32
    %c0_i32_0 = arith.constant 0 : i32
    %c0_i32_1 = arith.constant 0 : i32
    return %c0_i32, %c0_i32_0 : i32, i32
  }
  func.func @transform_5(%arg0: i32) -> (i32, i32) {
    %c0_i32 = arith.constant 0 : i32
    %c0_i32_0 = arith.constant 0 : i32
    %c0_i32_1 = arith.constant 0 : i32
    return %c0_i32, %c0_i32_0 : i32, i32
  }
  func.func @transform_6(%arg0: i32) -> (i32, i32) {
    %c0_i32 = arith.constant 0 : i32
    %c0_i32_0 = arith.constant 0 : i32
    %c0_i32_1 = arith.constant 0 : i32
    return %c0_i32, %c0_i32_0 : i32, i32
  }
  func.func @transform_7(%arg0: i32) -> (i32, i32) {
    %c0_i32 = arith.constant 0 : i32
    %c0_i32_0 = arith.constant 0 : i32
    return %arg0, %c0_i32 : i32, i32
  }
}

</mosaic_0001>

<bundles_post_ra>
// kernel: mlp_encoder_pallas.1
= control target key start
LH: loop header
LB: loop body
LE: loop exit
PB: predicated region body
PF: predicated region fallthrough
CT: control target
= control target key end

     0   :  { %v845_v2 = vmov 0   ;;  %s1105_s0 = inlined_call_operand.vmem [shape: bf16[16,128], index: 0, kind: input, shape index: {}]   ;;  %s1106_s1 = inlined_call_operand.vmem [shape: bf16[128,256], index: 1, kind: input, shape index: {}]   ;;  %s1107_s2 = inlined_call_operand.vmem [shape: f32[1,256], index: 2, kind: input, shape index: {}]   ;;  %s1108_s3 = inlined_call_operand.vmem [shape: bf16[256,256], index: 3, kind: input, shape index: {}]   ;;  %s1109_s4 = inlined_call_operand.vmem [shape: f32[1,256], index: 4, kind: input, shape index: {}]   ;;  %s1110_s5 = inlined_call_operand.vmem [shape: bf16[256,128], index: 5, kind: input, shape index: {}]   ;;  %s1111_s6 = inlined_call_operand.vmem [shape: f32[1,128], index: 6, kind: input, shape index: {}]   ;;  %s1112_s7 = inlined_call_operand.hbm [shape: f32[16,128], index: 7, kind: output, shape index: {}]  }
   0x1   :  { %v732_v0 = vld [vmem:[%s1106_s1 + $0x4] ss:$8 sps:$4 sm:$0xff]   ;;  %v734_v1 = vld [vmem:[%s1106_s1] ss:$8 sps:$4 sm:$0xff]   ;;  %176 = vmatprep.mubr.bf16.mxu0 %v845_v2  ;;  %v735_v3 = vld [vmem:[%s1106_s1 + $0x14] ss:$8 sps:$4 sm:$0xff]  }
   0x2   :  { %144 = vmatprep.subr.bf16.mxu0 %v732_v0  ;;  %v737_v4 = vld [vmem:[%s1106_s1 + $0x10] ss:$8 sps:$4 sm:$0xff]   ;;  %v738_v5 = vld [vmem:[%s1106_s1 + $0x24] ss:$8 sps:$4 sm:$0xff]   ;;  %v740_v6 = vld [vmem:[%s1106_s1 + $0x20] ss:$8 sps:$4 sm:$0xff]  }
   0x3   :  { %145 = vmatpush1.bf16.msra.mxu0 %v734_v1  ;;  %v741_v7 = vld [vmem:[%s1106_s1 + $0x34] ss:$8 sps:$4 sm:$0xff]   ;;  %v743_v8 = vld [vmem:[%s1106_s1 + $0x30] ss:$8 sps:$4 sm:$0xff]   ;;  %v744_v9 = vld [vmem:[%s1106_s1 + $0x44] ss:$8 sps:$4 sm:$0xff]  }
   0x4   :  { %146 = vmatprep.subr.bf16.mxu0 %v735_v3  ;;  %v757_v10 = vld [vmem:[%s1108_s3 + $0x4] ss:$8 sps:$4 sm:$0xff]   ;;  %v759_v11 = vld [vmem:[%s1108_s3] ss:$8 sps:$4 sm:$0xff]   ;;  %v760_v12 = vld [vmem:[%s1108_s3 + $0x14] ss:$8 sps:$4 sm:$0xff]  }
   0x5   :  { %397 = vmatprep.subr.bf16.mxu1 %v757_v10  ;;  %v746_v13 = vld [vmem:[%s1106_s1 + $0x40] ss:$8 sps:$4 sm:$0xff]   ;;  %v762_v14 = vld [vmem:[%s1108_s3 + $0x10] ss:$8 sps:$4 sm:$0xff]   ;;  %v747_v15 = vld [vmem:[%s1106_s1 + $0x54] ss:$8 sps:$4 sm:$0xff]  }
   0x6   :  { %398 = vmatpush1.bf16.msra.mxu1 %v759_v11  ;;  %v763_v16 = vld [vmem:[%s1108_s3 + $0x24] ss:$8 sps:$4 sm:$0xff]   ;;  %v749_v17 = vld [vmem:[%s1106_s1 + $0x50] ss:$8 sps:$4 sm:$0xff]   ;;  %v765_v18 = vld [vmem:[%s1108_s3 + $0x20] ss:$8 sps:$4 sm:$0xff]  }
   0x7   :  { %147 = vmatpush1.bf16.msra.mxu0 %v737_v4  ;;  %399 = vmatprep.subr.bf16.mxu1 %v760_v12  ;;  %v750_v19 = vld [vmem:[%s1106_s1 + $0x64] ss:$8 sps:$4 sm:$0xff]   ;;  %v766_v20 = vld [vmem:[%s1108_s3 + $0x34] ss:$8 sps:$4 sm:$0xff]   ;;  %v752_v21 = vld [vmem:[%s1106_s1 + $0x60] ss:$8 sps:$4 sm:$0xff]  }
   0x8   :  { %148 = vmatprep.subr.bf16.mxu0 %v738_v5  ;;  %v768_v22 = vld [vmem:[%s1108_s3 + $0x30] ss:$8 sps:$4 sm:$0xff]   ;;  %v753_v23 = vld [vmem:[%s1106_s1 + $0x74] ss:$8 sps:$4 sm:$0xff]   ;;  %v769_v24 = vld [vmem:[%s1108_s3 + $0x44] ss:$8 sps:$4 sm:$0xff]  }
   0x9   :  { %v755_v25 = vld [vmem:[%s1106_s1 + $0x70] ss:$8 sps:$4 sm:$0xff]   ;;  %v771_v26 = vld [vmem:[%s1108_s3 + $0x40] ss:$8 sps:$4 sm:$0xff]   ;;  %v772_v28 = vld [vmem:[%s1108_s3 + $0x54] ss:$8 sps:$4 sm:$0xff]  }
   0xa   :  { %400 = vmatpush1.bf16.msra.mxu1 %v762_v14  ;;  %v756_v27 = vld [vmem:[%s1105_s0] sm:$0xff]   ;;  %v774_v29 = vld [vmem:[%s1108_s3 + $0x50] ss:$8 sps:$4 sm:$0xff]   ;;  %v778_v32 = vld [vmem:[%s1108_s3 + $0x74] ss:$8 sps:$4 sm:$0xff]  }
   0xb   :  { %149 = vmatpush1.bf16.msra.mxu0 %v740_v6  ;;  %401 = vmatprep.subr.bf16.mxu1 %v763_v16  ;;  %v775_v30 = vld [vmem:[%s1108_s3 + $0x64] ss:$8 sps:$4 sm:$0xff]   ;;  %v777_v31 = vld [vmem:[%s1108_s3 + $0x60] ss:$8 sps:$4 sm:$0xff]   ;;  %v780_v33 = vld [vmem:[%s1108_s3 + $0x70] ss:$8 sps:$4 sm:$0xff]  }
   0xc   :  { %150 = vmatprep.subr.bf16.mxu0 %v741_v7  ;;  %v781_v34 = vld [vmem:[%s1108_s3 + $0x84] ss:$8 sps:$4 sm:$0xff]  }
   0xe   :  { %402 = vmatpush1.bf16.msra.mxu1 %v765_v18 }
   0xf   :  { %151 = vmatpush1.bf16.msra.mxu0 %v743_v8  ;;  %403 = vmatprep.subr.bf16.mxu1 %v766_v20 }
  0x10   :  { %152 = vmatprep.subr.bf16.mxu0 %v744_v9 }
  0x12   :  { %404 = vmatpush1.bf16.msra.mxu1 %v768_v22 }
  0x13   :  { %153 = vmatpush1.bf16.msra.mxu0 %v746_v13  ;;  %405 = vmatprep.subr.bf16.mxu1 %v769_v24 }
  0x14   :  { %154 = vmatprep.subr.bf16.mxu0 %v747_v15 }
  0x16   :  { %406 = vmatpush1.bf16.msra.mxu1 %v771_v26 }
  0x17   :  { %155 = vmatpush1.bf16.msra.mxu0 %v749_v17  ;;  %407 = vmatprep.subr.bf16.mxu1 %v772_v28 }
  0x18   :  { %156 = vmatprep.subr.bf16.mxu0 %v750_v19 }
  0x1a   :  { %408 = vmatpush1.bf16.msra.mxu1 %v774_v29 }
  0x1b   :  { %157 = vmatpush1.bf16.msra.mxu0 %v752_v21  ;;  %409 = vmatprep.subr.bf16.mxu1 %v775_v30 }
  0x1c   :  { %158 = vmatprep.subr.bf16.mxu0 %v753_v23 }
  0x1e   :  { %410 = vmatpush1.bf16.msra.mxu1 %v777_v31 }
  0x1f   :  { %159 = vmatpush1.bf16.msra.mxu0 %v755_v25  ;;  %411 = vmatprep.subr.bf16.mxu1 %v778_v32 }
  0x22   :  { %177 = vmatmul.mubr.bf16.vlgmr.msra.gmra.mrb[0].mxu0 %v756_v27 }
  0x23   :  { %12 = vsyncpa [#allocation3], 0  ;;  %412 = vmatpush1.bf16.msra.mxu1 %v780_v33  ;;  %v783_v35 = vld [vmem:[%s1108_s3 + $0x80] ss:$8 sps:$4 sm:$0xff]   ;;  %v784_v36 = vld [vmem:[%s1108_s3 + $0x94] ss:$8 sps:$4 sm:$0xff]   ;;  %v48_v61 = vlaneseq }
  0x24   :  { %413 = vmatprep.subr.bf16.mxu1 %v781_v34  ;;  %v786_v37 = vld [vmem:[%s1108_s3 + $0x90] ss:$8 sps:$4 sm:$0xff]   ;;  %v787_v38 = vld [vmem:[%s1108_s3 + $0xa4] ss:$8 sps:$4 sm:$0xff]   ;;  %v789_v39 = vld [vmem:[%s1108_s3 + $0xa0] ss:$8 sps:$4 sm:$0xff]  }
  0x25   :  { %v790_v40 = vld [vmem:[%s1108_s3 + $0xb4] ss:$8 sps:$4 sm:$0xff]   ;;  %v792_v41 = vld [vmem:[%s1108_s3 + $0xb0] ss:$8 sps:$4 sm:$0xff]   ;;  %v793_v42 = vld [vmem:[%s1108_s3 + $0xc4] ss:$8 sps:$4 sm:$0xff]  }
  0x26   :  { %v795_v43 = vld [vmem:[%s1108_s3 + $0xc0] ss:$8 sps:$4 sm:$0xff]   ;;  %v796_v44 = vld [vmem:[%s1108_s3 + $0xd4] ss:$8 sps:$4 sm:$0xff]   ;;  %v798_v45 = vld [vmem:[%s1108_s3 + $0xd0] ss:$8 sps:$4 sm:$0xff]  }
  0x27   :  { %414 = vmatpush1.bf16.msra.mxu1 %v783_v35  ;;  %v799_v46 = vld [vmem:[%s1108_s3 + $0xe4] ss:$8 sps:$4 sm:$0xff]   ;;  %v801_v47 = vld [vmem:[%s1108_s3 + $0xe0] ss:$8 sps:$4 sm:$0xff]   ;;  %v802_v48 = vld [vmem:[%s1108_s3 + $0xf4] ss:$8 sps:$4 sm:$0xff]  }
  0x28   :  { %415 = vmatprep.subr.bf16.mxu1 %v784_v36  ;;  %v804_v49 = vld [vmem:[%s1108_s3 + $0xf0] ss:$8 sps:$4 sm:$0xff]   ;;  %v805_v50 = vld [vmem:[%s1110_s5 + $0x40] sm:$0xff]   ;;  %v807_v52 = vld [vmem:[%s1110_s5 + $0x48] sm:$0xff]   ;;  %v49_v62 = vshrl.u32 %v48_v61, 7  ;;  %s846_s11 = smov [#allocation2]  }
  0x29   :  { %v806_v51 = vld [vmem:[%s1110_s5] sm:$0xff]   ;;  %706 = vmatprep.subr.bf16.mxu0 %v805_v50  ;;  %v808_v53 = vld [vmem:[%s1110_s5 + $0x8] sm:$0xff]   ;;  %v809_v54 = vld [vmem:[%s1110_s5 + $0x50] sm:$0xff]   ;;  %s629_s12 = sshll.u32 %s846_s11, 4  ;;  %s630_s12 = int_to_ptr.vmem [resolvable:$true] %s629_s12 }
  0x2a   :  { %707 = vmatpush3.bf16.msra.mxu0 %v806_v51  ;;  %v810_v55 = vld [vmem:[%s1110_s5 + $0x10] sm:$0xff]   ;;  %v811_v56 = vld [vmem:[%s1110_s5 + $0x58] sm:$0xff]   ;;  %v813_v58 = vld [vmem:[%s1110_s5 + $0x60] sm:$0xff]   ;;  %v50_v63 = vsub.s32 0, %v49_v62  ;;  %v54_v1 = vsub.s32 1, %v49_v62  ;;  %s821_s1 = scalar_lea.vmem %s630_s12, 256  ;;  %p826_p1 = scmp.lt.s32.totalorder %s630_s12, %s630_s12 }
  0x2b   :  { %416 = vmatpush1.bf16.msra.mxu1 %v786_v37  ;;  %708 = vmatprep.subr.bf16.mxu0 %v807_v52  ;;  %v812_v57 = vld [vmem:[%s1110_s5 + $0x18] sm:$0xff]   ;;  %v814_v59 = vld [vmem:[%s1110_s5 + $0x20] sm:$0xff]   ;;  %v815_v60 = vld [vmem:[%s1110_s5 + $0x68] sm:$0xff]   ;;  %p822_p0 = scmp.ne.s32.totalorder %s630_s12, %s821_s1  ;;  %p827_p2 = scmp.lt.s32.totalorder %s821_s1, %s821_s1 }
  0x2c   :  { %417 = vmatprep.subr.bf16.mxu1 %v787_v38  ;;  %v46_v0 = vld [vmem:[%s1107_s2] sm:$0x3]  ;;  %v816_v18 = vld [vmem:[%s1110_s5 + $0x28] sm:$0xff]   ;;  %v817_v19 = vld [vmem:[%s1110_s5 + $0x70] sm:$0xff]  }
  0x2d   :  { %v51_v2 = vrot.slane %v46_v0, %v50_v63  ;;  %v55_v3 = vrot.slane %v46_v0, %v54_v1  ;;  %v818_v20 = vld [vmem:[%s1110_s5 + $0x30] sm:$0xff]   ;;  %v819_v21 = vld [vmem:[%s1110_s5 + $0x78] sm:$0xff]   ;;  %v225_v23 = vld [vmem:[%s1109_s4] sm:$0x3]  ;;  %p828_p3 = por %p827_p2, %p826_p1 }
  0x2e   :  { %709 = vmatpush3.bf16.msra.mxu0 %v808_v53  ;;  %v820_v22 = vld [vmem:[%s1110_s5 + $0x38] sm:$0xff]   ;;  %v230_v24 = vrot.slane %v225_v23, %v50_v63  ;;  %v234_v25 = vrot.slane %v225_v23, %v54_v1 }
  0x2f   :  { %418 = vmatpush1.bf16.msra.mxu1 %v789_v39  ;;  %710 = vmatprep.subr.bf16.mxu0 %v809_v54  ;;  %p829_p4 = pnand %p828_p3, %p822_p0 }
  0x30   :  { %419 = vmatprep.subr.bf16.mxu1 %v790_v40 }
  0x32   :  { %711 = vmatpush3.bf16.msra.mxu0 %v810_v55 }
  0x33   :  { %420 = vmatpush1.bf16.msra.mxu1 %v792_v41  ;;  %712 = vmatprep.subr.bf16.mxu0 %v811_v56  ;;  %v689_v41 = vld [vmem:[%s1111_s6] ss:$0 sm:$0xff] }
  0x34   :  { %421 = vmatprep.subr.bf16.mxu1 %v793_v42 }
  0x36   :  { %713 = vmatpush3.bf16.msra.mxu0 %v812_v57 }
  0x37   :  { %422 = vmatpush1.bf16.msra.mxu1 %v795_v43  ;;  %714 = vmatprep.subr.bf16.mxu0 %v813_v58 }
  0x38   :  { %423 = vmatprep.subr.bf16.mxu1 %v796_v44 }
  0x3a   :  { %715 = vmatpush3.bf16.msra.mxu0 %v814_v59 }
  0x3b   :  { %424 = vmatpush1.bf16.msra.mxu1 %v798_v45  ;;  %716 = vmatprep.subr.bf16.mxu0 %v815_v60 }
  0x3c   :  { %425 = vmatprep.subr.bf16.mxu1 %v799_v46 }
  0x3e   :  { %717 = vmatpush3.bf16.msra.mxu0 %v816_v18 }
  0x3f   :  { %426 = vmatpush1.bf16.msra.mxu1 %v801_v47  ;;  %718 = vmatprep.subr.bf16.mxu0 %v817_v19 }
  0x40   :  { %427 = vmatprep.subr.bf16.mxu1 %v802_v48 }
  0x42   :  { %719 = vmatpush3.bf16.msra.mxu0 %v818_v20 }
  0x43   :  { %428 = vmatpush1.bf16.msra.mxu1 %v804_v49  ;;  %720 = vmatprep.subr.bf16.mxu0 %v819_v21 }
  0x46   :  { %721 = vmatpush3.bf16.msra.mxu0 %v820_v22 }
  0xf5   :  { %v178_v4 = vpop.f32.mrb[0].mxu0 }
  0xf6   :  { %v179_v5 = vadd.f32 %v178_v4, %v51_v2  ;;  %v180_v6 = vpop.f32.mrb[1].mxu0 }
  0xf7   :  { %v181_v7 = vadd.f32 %v180_v6, %v55_v3  ;;  %v182_v8 = vpop.f32.mrb[2].mxu0 }
  0xf8   :  { %v183_v9 = vadd.f32 %v182_v8, %v51_v2  ;;  %v184_v10 = vpop.f32.mrb[3].mxu0  ;;  %v187_v12 = vmax.f32 %v179_v5, 0.0 }
  0xf9   :  { %v185_v11 = vadd.f32 %v184_v10, %v55_v3  ;;  %v188_v14 = vmax.f32 %v181_v7, 0.0 }
  0xfa   :  { %v189_v13 = vmax.f32 %v183_v9, 0.0 }
  0xfb   :  { %v190_v15 = vmax.f32 %v185_v11, 0.0 }
  0xfc   :  { %v191_v16 = vpack.c.bf16 %v189_v13, %v187_v12 }
  0xfd   :  { %v192_v17 = vpack.c.bf16 %v190_v15, %v188_v14 }
  0xff   :  { %429 = vmatprep.mubr.bf16.mxu1 %v192_v17 }
 0x100   :  { %430 = vmatmul.mubr.bf16.vlgmr.msra.gmra.mrb[0].mxu1 %v191_v16 }
 0x1d3   :  { %v431_v26 = vpop.f32.mrb[0].mxu1 }
 0x1d4   :  { %v432_v27 = vadd.f32 %v431_v26, %v230_v24  ;;  %v433_v28 = vpop.f32.mrb[1].mxu1 }
 0x1d5   :  { %v434_v29 = vadd.f32 %v433_v28, %v234_v25  ;;  %v435_v30 = vpop.f32.mrb[2].mxu1 }
 0x1d6   :  { %v436_v31 = vadd.f32 %v435_v30, %v230_v24  ;;  %v437_v32 = vpop.f32.mrb[3].mxu1  ;;  %v440_v34 = vmax.f32 %v432_v27, 0.0 }
 0x1d7   :  { %v438_v33 = vadd.f32 %v437_v32, %v234_v25  ;;  %v441_v36 = vmax.f32 %v434_v29, 0.0 }
 0x1d8   :  { %v442_v35 = vmax.f32 %v436_v31, 0.0 }
 0x1d9   :  { %v443_v37 = vmax.f32 %v438_v33, 0.0 }
 0x1da   :  { %v444_v38 = vpack.c.bf16 %v442_v35, %v440_v34 }
 0x1db   :  { %v445_v39 = vpack.c.bf16 %v443_v37, %v441_v36 }
 0x1dd   :  { %613 = vmatprep.mubr.bf16.mxu0 %v445_v39 }
 0x1de   :  { %614 = vmatmul.mubr.bf16.vlgmr.msra.gmra.mrb[4].mxu0 %v444_v38 }
 0x2b1   :  { %v722_v40 = vpop.f32.mrb[4].mxu0 }
 0x2b2   :  { %v723_v42 = vpop.f32.mrb[5].mxu0 }
 0x2b3   :  { %v724_v43 = vadd.f32 %v723_v42, %v722_v40  ;;  %v725_v44 = vpop.f32.mrb[6].mxu0 }
 0x2b4   :  { %v726_v45 = vpop.f32.mrb[7].mxu0 }
 0x2b5   :  { %v616_v46 = vadd.f32 %v724_v43, %v689_v41  ;;  %v727_v47 = vadd.f32 %v726_v45, %v725_v44 }
 0x2b7   :  { %622 = vst [vmem:[#allocation2] sm:$0xff] %v616_v46  ;;  %v619_v48 = vadd.f32 %v727_v47, %v689_v41 }
 0x2b9   :  { %623 = vst [vmem:[#allocation2 + $0x8] sm:$0xff] %v619_v48 }
 0x2ba   :  { %832 = shalt.err (!%p829_p4)
}
 0x2bb   :  { %s833_s14 = scalar_lea.hbm %s1112_s7, 256 }
 0x2bc   :  { %p834_p5 = scmp.ne.s32.totalorder %s1112_s7, %s833_s14  ;;  %p837_p6 = scmp.lt.u32.totalorder %s833_s14, %s1112_s7 }
 0x2be   :  { %p839_p7 = pnand %p837_p6, %p834_p5 }
 0x2c0   :  { %842 = shalt.err (!%p839_p7)
}
 0x2c1   :  { %s847_s18 = smov 128   ;;  %s848_s19 = smov 8  }
 0x2c2   :  { %635 = dma.vmem_to_hbm [thread:$0]  %s630_s12, 256, %s1112_s7, [#allocation3], %s847_s18, %s847_s18, %s848_s19  }
 0x2c3   :  { %843 = dma.done.wait [#allocation3], 256  }
 0x2c4   :  { %844 = vsyncadd [#allocation3], 4294967040 }
 0x2c5   :  { %639 = vsyncpa [#allocation3], 1 }

</bundles_post_ra>
